<compile_context>
chip_gen: v7x
topology: tpu7x:2x2x1
jax: 0.10.0
libtpu: 0.0.40
codegen_flags: <defaults>
</compile_context>

<pallas_src>
import jax
import jax.numpy as jnp
import numpy as np
from jax.experimental import pallas as pl
from jax.experimental.pallas import tpu as pltpu


def _reorg_reference(x: jax.Array, stride: int = 2) -> jax.Array:
    """Pure-JAX reference matching the PyTorch Reorg module."""
    B, C, H, W = x.shape
    s = stride
    y = x.reshape(B, C, H // s, s, W // s, s)
    y = y.transpose(0, 3, 5, 1, 2, 4)  # (B, dh, dw, C, H/s, W/s)
    return y.reshape(B, s * s * C, H // s, W // s)


def _vmem_capacity_bytes() -> int:
    try:
        info = pltpu.get_tpu_info()
        for attr in ("vmem_capacity_bytes", "vmem_bytes", "vmem_size_bytes"):
            v = getattr(info, attr, None)
            if v:
                return int(v)
    except Exception:
        pass
    return 64 * 1024 * 1024  # conservative fallback (safe on v7x too)


def _pick_tile(num_rows: int, bytes_per_row: int, align: int, cap: int,
               min_tiles: int = 1) -> int:
    """Largest sublane-aligned row tile whose input block stays under `cap` bytes,
    with at least `min_tiles` grid tiles when possible.  The last block may be
    partial (Pallas masks it); a full-extent tile is always a legal block dim."""
    target = max(1, cap // max(bytes_per_row, 1))
    if min_tiles > 1:
        target = min(target, -(-num_rows // min_tiles))
    t = min(num_rows, target)
    if t >= num_rows:
        return num_rows
    t = (t // align) * align
    if t == 0:
        t = align if num_rows > align else num_rows
    return t


def _build_sel_lane(s: int, W: int, Wo: int, dtype) -> jax.Array:
    """sel[k, w, w'] = 1 iff w == w'*s + (k % s).  Shape (s*s, W, Wo)."""
    k = np.arange(s * s)[:, None, None]
    w = np.arange(W)[None, :, None]
    wo = np.arange(Wo)[None, None, :]
    sel = (w == wo * s + (k % s))
    return jnp.asarray(sel, dtype=dtype)


def _build_sel_full(s: int, H: int, W: int, Ho: int, Wo: int, dtype) -> jax.Array:
    """sel[k, h*W+w, h'*Wo+w'] = 1 iff h == h'*s + k//s and w == w'*s + k%s."""
    k = np.arange(s * s)
    dh = (k // s)[:, None, None, None, None]
    dw = (k % s)[:, None, None, None, None]
    h = np.arange(H)[None, :, None, None, None]
    w = np.arange(W)[None, None, :, None, None]
    ho = np.arange(Ho)[None, None, None, :, None]
    wo = np.arange(Wo)[None, None, None, None, :]
    sel = (h == ho * s + dh) & (w == wo * s + dw)
    return jnp.asarray(sel.reshape(s * s, H * W, Ho * Wo), dtype=dtype)


def _make_kernel(s: int, slice_w: int):
    """slice_w == 0: contract over the full lane extent (small-map path).
       slice_w == W: per-k contract over the dh-th W-wide lane slice (wide path)."""
    def kernel(x_ref, sel_ref, o_ref):
        if slice_w:
            halves = [x_ref[0, :, dh * slice_w:(dh + 1) * slice_w]
                      for dh in range(s)]
        else:
            halves = [x_ref[0]]
        for k in range(s * s):
            lhs = halves[(k // s) if slice_w else 0]
            o_ref[0, k] = jnp.dot(
                lhs, sel_ref[k], preferred_element_type=jnp.float32
            ).astype(o_ref.dtype)
    return kernel


def reorg_forward(x: jax.Array, stride: int = 2) -> jax.Array:
    assert x.ndim == 4, "Reorg expects NCHW input"
    B, C, H, W = map(int, x.shape)
    s = int(stride)
    assert H % s == 0 and W % s == 0
    Ho, Wo = H // s, W // s

    if not jnp.issubdtype(x.dtype, jnp.floating):
        # TODO(synk): integer/bool dtypes need a non-MXU (gather-based) Pallas path;
        # use the exact pure-JAX reshape/transpose fallback for them.
        return _reorg_reference(x, s)

    itemsize = jnp.dtype(x.dtype).itemsize
    align = max(8, 32 // itemsize)        # sublane packing: f32->8, bf16->16, int8->32
    min_tiles = 2 if B == 1 else 1        # keep both v7x TensorCores busy when B == 1

    vmem_cap = _vmem_capacity_bytes()
    vmem_limit = int(min(64 * 1024 * 1024, max(vmem_cap * 3 // 4, 32 * 1024 * 1024)))

    LANE = 128
    sel_full_bytes = s * s * H * W * Ho * Wo * itemsize
    use_dense_lanes = (Wo < LANE) and (sel_full_bytes <= (4 << 20))

    if use_dense_lanes:
        # Small-map path: lanes = H*W in / Ho*Wo out (dense stores), tile channels.
        sel = _build_sel_full(s, H, W, Ho, Wo, x.dtype)
        x_view = x.reshape(B, C, H * W)
        rows, row_bytes = C, H * W * itemsize
        out_view_shape = (B, s * s, C, Ho * Wo)
        contract, slice_w = H * W, 0
    else:
        # Wide-map path: rows = (c, h'), lanes = (dh, w); contract only over W.
        sel = _build_sel_lane(s, W, Wo, x.dtype)
        x_view = x.reshape(B, C * Ho, s * W)
        rows, row_bytes = C * Ho, s * W * itemsize
        out_view_shape = (B, s * s, C * Ho, Wo)
        contract, slice_w = W, W

    sel_bytes = int(sel.size) * itemsize
    # Budget: 2x input block + 2x (lane-padded) output block + resident sel + slack.
    block_cap = max((vmem_limit - sel_bytes - (1 << 20)) // 6, 256 * 1024)
    tile = _pick_tile(rows, row_bytes, align, block_cap, min_tiles)
    n_tiles = pl.cdiv(rows, tile)

    lane_in = x_view.shape[-1]
    lane_out = out_view_shape[-1]

    cost = pl.CostEstimate(
        flops=2 * B * C * H * W * contract,
        transcendentals=0,
        bytes_accessed=2 * B * C * H * W * itemsize + sel_bytes,
    )

    out = pl.pallas_call(
        _make_kernel(s, slice_w),
        out_shape=jax.ShapeDtypeStruct(out_view_shape, x.dtype),
        grid=(B, n_tiles),
        in_specs=[
            pl.BlockSpec((1, tile, lane_in), lambda b, t: (b, t, 0)),
            pl.BlockSpec(sel.shape, lambda b, t: (0, 0, 0)),   # resident, DMA'd once
        ],
        out_specs=pl.BlockSpec((1, s * s, tile, lane_out),
                               lambda b, t: (b, 0, t, 0)),
        compiler_params=pltpu.CompilerParams(
            dimension_semantics=("parallel", "parallel"),
            vmem_limit_bytes=vmem_limit,
        ),
        cost_estimate=cost,
    )(x_view, sel)

    # Free view back to Reorg output layout: (k, c, h') rows -> (k*C + c, h', w').
    return out.reshape(B, s * s * C, Ho, Wo)


if __name__ == "__main__":
    key = jax.random.PRNGKey(0)
    k1, k2 = jax.random.split(key)

    # Small feature map (Wo < 128): exercises the lane-dense small-map path.
    x_small = jax.random.normal(k1, (2, 4, 16, 16), dtype=jnp.float32)
    y_small = reorg_forward(x_small, stride=2)
    jax.block_until_ready(y_small)
    ref_small = _reorg_reference(x_small, stride=2)
    assert y_small.shape == ref_small.shape == (2, 16, 8, 8)
    assert y_small.dtype == x_small.dtype
    assert bool(jnp.allclose(y_small, ref_small, rtol=1e-6, atol=1e-6))

    # Wide feature map (Wo >= 128): exercises the dh-sliced contraction path.
    x_wide = jax.random.normal(k2, (1, 2, 8, 256), dtype=jnp.float32)
    y_wide = reorg_forward(x_wide, stride=2)
    jax.block_until_ready(y_wide)
    ref_wide = _reorg_reference(x_wide, stride=2)
    assert y_wide.shape == ref_wide.shape == (1, 8, 4, 128)
    assert bool(jnp.allclose(y_wide, ref_wide, rtol=1e-6, atol=1e-6))

    print("KERNEL_OK")
</pallas_src>

<mosaic_0001>
module attributes {stable_mosaic.version = 11 : i64} {
  func.func @kernel(%arg0: i32, %arg1: i32, %arg2: memref<1x4x256xf32, #tpu.memory_space<vmem>>, %arg3: memref<4x256x64xf32, #tpu.memory_space<vmem>>, %arg4: memref<1x4x4x64xf32, #tpu.memory_space<vmem>>) attributes {dimension_semantics = [#tpu.dimension_semantics<parallel>, #tpu.dimension_semantics<parallel>], iteration_bounds = array<i64: 2, 1>, scalar_prefetch = 0 : i64, scratch_operands = 0 : i64, tpu.core_type = #tpu.core_type<tc>, window_params = [{transform_indices = @transform_0, window_bounds = array<i64: 1, 4, 256>}, {pipeline_mode = #tpu.pipeline_mode<synchronous>, transform_indices = @transform_1, window_bounds = array<i64: 4, 256, 64>}, {transform_indices = @transform_2, window_bounds = array<i64: 1, 4, 4, 64>}]} {
    %c0 = arith.constant 0 : index
    %c0_0 = arith.constant 0 : index
    %c0_1 = arith.constant 0 : index
    %0 = vector.load %arg2[%c0, %c0_0, %c0_1] : memref<1x4x256xf32, #tpu.memory_space<vmem>>, vector<1x4x256xf32>
    %1 = vector.shape_cast %0 : vector<1x4x256xf32> to vector<4x256xf32>
    %c0_2 = arith.constant 0 : index
    %c0_3 = arith.constant 0 : index
    %c0_4 = arith.constant 0 : index
    %2 = vector.load %arg3[%c0_2, %c0_3, %c0_4] : memref<4x256x64xf32, #tpu.memory_space<vmem>>, vector<1x256x64xf32>
    %3 = vector.shape_cast %2 : vector<1x256x64xf32> to vector<256x64xf32>
    %cst = arith.constant dense<0.000000e+00> : vector<4x64xf32>
    %4 = tpu.matmul %1, %3, %cst {dimension_numbers = #tpu.dot_dimension_numbers<[1], [0], [0], [1], [0, 0, 1, 1], [], []>} : vector<4x256xf32>, vector<256x64xf32>, vector<4x64xf32> -> vector<4x64xf32>
    %c0_5 = arith.constant 0 : index
    %c0_6 = arith.constant 0 : index
    %c0_7 = arith.constant 0 : index
    %c0_8 = arith.constant 0 : index
    %5 = vector.load %arg4[%c0_5, %c0_6, %c0_7, %c0_8] : memref<1x4x4x64xf32, #tpu.memory_space<vmem>>, vector<1x1x4x64xf32>
    %6 = vector.shape_cast %5 : vector<1x1x4x64xf32> to vector<4x64xf32>
    %7 = vector.shape_cast %4 : vector<4x64xf32> to vector<1x1x4x64xf32>
    tpu.vector_store %arg4[%c0_5, %c0_6, %c0_7, %c0_8], %7 {strides = array<i32>} : memref<1x4x4x64xf32, #tpu.memory_space<vmem>>, vector<1x1x4x64xf32>,
    %c1 = arith.constant 1 : index
    %c0_9 = arith.constant 0 : index
    %c0_10 = arith.constant 0 : index
    %8 = vector.load %arg3[%c1, %c0_9, %c0_10] : memref<4x256x64xf32, #tpu.memory_space<vmem>>, vector<1x256x64xf32>
    %9 = vector.shape_cast %8 : vector<1x256x64xf32> to vector<256x64xf32>
    %cst_11 = arith.constant dense<0.000000e+00> : vector<4x64xf32>
    %10 = tpu.matmul %1, %9, %cst_11 {dimension_numbers = #tpu.dot_dimension_numbers<[1], [0], [0], [1], [0, 0, 1, 1], [], []>} : vector<4x256xf32>, vector<256x64xf32>, vector<4x64xf32> -> vector<4x64xf32>
    %c0_12 = arith.constant 0 : index
    %c1_13 = arith.constant 1 : index
    %c0_14 = arith.constant 0 : index
    %c0_15 = arith.constant 0 : index
    %11 = vector.load %arg4[%c0_12, %c1_13, %c0_14, %c0_15] : memref<1x4x4x64xf32, #tpu.memory_space<vmem>>, vector<1x1x4x64xf32>
    %12 = vector.shape_cast %11 : vector<1x1x4x64xf32> to vector<4x64xf32>
    %13 = vector.shape_cast %10 : vector<4x64xf32> to vector<1x1x4x64xf32>
    tpu.vector_store %arg4[%c0_12, %c1_13, %c0_14, %c0_15], %13 {strides = array<i32>} : memref<1x4x4x64xf32, #tpu.memory_space<vmem>>, vector<1x1x4x64xf32>,
    %c2 = arith.constant 2 : index
    %c0_16 = arith.constant 0 : index
    %c0_17 = arith.constant 0 : index
    %14 = vector.load %arg3[%c2, %c0_16, %c0_17] : memref<4x256x64xf32, #tpu.memory_space<vmem>>, vector<1x256x64xf32>
    %15 = vector.shape_cast %14 : vector<1x256x64xf32> to vector<256x64xf32>
    %cst_18 = arith.constant dense<0.000000e+00> : vector<4x64xf32>
    %16 = tpu.matmul %1, %15, %cst_18 {dimension_numbers = #tpu.dot_dimension_numbers<[1], [0], [0], [1], [0, 0, 1, 1], [], []>} : vector<4x256xf32>, vector<256x64xf32>, vector<4x64xf32> -> vector<4x64xf32>
    %c0_19 = arith.constant 0 : index
    %c2_20 = arith.constant 2 : index
    %c0_21 = arith.constant 0 : index
    %c0_22 = arith.constant 0 : index
    %17 = vector.load %arg4[%c0_19, %c2_20, %c0_21, %c0_22] : memref<1x4x4x64xf32, #tpu.memory_space<vmem>>, vector<1x1x4x64xf32>
    %18 = vector.shape_cast %17 : vector<1x1x4x64xf32> to vector<4x64xf32>
    %19 = vector.shape_cast %16 : vector<4x64xf32> to vector<1x1x4x64xf32>
    tpu.vector_store %arg4[%c0_19, %c2_20, %c0_21, %c0_22], %19 {strides = array<i32>} : memref<1x4x4x64xf32, #tpu.memory_space<vmem>>, vector<1x1x4x64xf32>,
    %c3 = arith.constant 3 : index
    %c0_23 = arith.constant 0 : index
    %c0_24 = arith.constant 0 : index
    %20 = vector.load %arg3[%c3, %c0_23, %c0_24] : memref<4x256x64xf32, #tpu.memory_space<vmem>>, vector<1x256x64xf32>
    %21 = vector.shape_cast %20 : vector<1x256x64xf32> to vector<256x64xf32>
    %cst_25 = arith.constant dense<0.000000e+00> : vector<4x64xf32>
    %22 = tpu.matmul %1, %21, %cst_25 {dimension_numbers = #tpu.dot_dimension_numbers<[1], [0], [0], [1], [0, 0, 1, 1], [], []>} : vector<4x256xf32>, vector<256x64xf32>, vector<4x64xf32> -> vector<4x64xf32>
    %c0_26 = arith.constant 0 : index
    %c3_27 = arith.constant 3 : index
    %c0_28 = arith.constant 0 : index
    %c0_29 = arith.constant 0 : index
    %23 = vector.load %arg4[%c0_26, %c3_27, %c0_28, %c0_29] : memref<1x4x4x64xf32, #tpu.memory_space<vmem>>, vector<1x1x4x64xf32>
    %24 = vector.shape_cast %23 : vector<1x1x4x64xf32> to vector<4x64xf32>
    %25 = vector.shape_cast %22 : vector<4x64xf32> to vector<1x1x4x64xf32>
    tpu.vector_store %arg4[%c0_26, %c3_27, %c0_28, %c0_29], %25 {strides = array<i32>} : memref<1x4x4x64xf32, #tpu.memory_space<vmem>>, vector<1x1x4x64xf32>,
    return
  }
  func.func @transform_0(%arg0: i32, %arg1: i32) -> (i32, i32, i32) {
    %c0_i32 = arith.constant 0 : i32
    %c0_i32_0 = arith.constant 0 : i32
    return %arg0, %arg1, %c0_i32 : i32, i32, i32
  }
  func.func @transform_1(%arg0: i32, %arg1: i32) -> (i32, i32, i32) {
    %c0_i32 = arith.constant 0 : i32
    %c0_i32_0 = arith.constant 0 : i32
    %c0_i32_1 = arith.constant 0 : i32
    %c0_i32_2 = arith.constant 0 : i32
    return %c0_i32, %c0_i32_0, %c0_i32_1 : i32, i32, i32
  }
  func.func @transform_2(%arg0: i32, %arg1: i32) -> (i32, i32, i32, i32) {
    %c0_i32 = arith.constant 0 : i32
    %c0_i32_0 = arith.constant 0 : i32
    %c0_i32_1 = arith.constant 0 : i32
    return %arg0, %c0_i32, %arg1, %c0_i32_0 : i32, i32, i32, i32
  }
}

</mosaic_0001>

<bundles_post_ra>
// kernel: tpu_custom_call.1
= control target key start
LH: loop header
LB: loop body
LE: loop exit
PB: predicated region body
PF: predicated region fallthrough
CT: control target
= control target key end

     0   :  { %7 = vsyncpa [#allocation3], 0  ;;  %s1749_s0 = inlined_call_operand.vmem [shape: f32[2,4,256], index: 0, kind: input, shape index: {}]   ;;  %s1750_s1 = inlined_call_operand.vmem [shape: f32[4,256,64], index: 1, kind: input, shape index: {}]   ;;  %s1751_s2 = inlined_call_operand.hbm [shape: f32[2,4,4,64], index: 2, kind: output, shape index: {}]  }
   0x1   :  { %9 = vsyncpa [#allocation3 + $0x1], 0  ;;  %s1227_s9 = smov 0   ;;  %s1229_s10 = smov 0  }
   0x2   :  { %s1231_s11 = smov 0   ;;  %s1233_s12 = smov 0  }
   0x3   :  { %s1235_s13 = smov 0   ;;  %s1237_s14 = smov 0  }
   0x4 LB: > { %s689_s15 = sadd.s32 4294967295, %s1207_s14   ;;  %s690_s16 = sadd.s32 4294967294, %s1207_s14   ;;  %s1207_s14 = sphi %s1237_s14, %s15_s14   ;;  %s1203_s13 = sphi %s1235_s13, %s1758_s13   ;;  %s1199_s12 = sphi %s1233_s12, %s1757_s12   ;;  %s1195_s11 = sphi %s1231_s11, %s1756_s11   ;;  %s1191_s10 = sphi %s1229_s10, %s1755_s10   ;;  %s1187_s9 = sphi %s1227_s9, %s1754_s9  }
   0x5   : > { %s27_s17 = sadd.s32 1, %s1203_s13  ;;  %s85_s18 = sadd.s32 1, %s1195_s11 }
   0x6   : > { %p29_p0 = scmp.ge.s32.totalorder %s27_s17, 2  ;;  %p95_p1 = scmp.ne.s32.totalorder %s1195_s11, %s1191_s10 }
   0x7   : > { %p96_p2 = scmp.eq.s32.totalorder %s689_s15, 1  ;;  %p101_p3 = scmp.ne.s32.totalorder %s1191_s10, %s1187_s9 }
   0x8   : > { %s1760_s17 = smov (%p29_p0, %s27_s17), 0  ;;  %p102_p5 = scmp.eq.s32.totalorder %s690_s16, 1 }
   0x9   : > { %p1267_p4 = por %p96_p2, %p95_p1  ;;  %s80_s20 = ssub.s32 %s1203_s13, %s1760_s17 }
   0xa   : > { %p693_p6 = scmp.ge.s32.totalorder %s1207_s14, 1  ;;  %p83_p7 = scmp.eq.s32.totalorder %s80_s20, 0 }
   0xb   : > { %p1274_p8 = por %p102_p5, %p101_p3  ;;  %p135_p9 = scmp.lt.s32.totalorder %s1207_s14, 3 }
   0xc   : > { %s1280_s22 = scalar_select %p83_p7, %s1195_s11, %s85_s18  }
   0xd   : > { %p136_p10 = pnand %p693_p6, %p135_p9 }
   0xe   : > { %v187_v0 = vld [vmem:[%s1750_s1 + $0x80] sm:$0xff] (!%p136_p10)  ;;  %v188_v1 = vld [vmem:[%s1750_s1 + $0x88] sm:$0xff] (!%p136_p10)  ;;  %v189_v11 = vld [vmem:[%s1750_s1 + $0x90] sm:$0xff] (!%p136_p10)  ;;  %p161_p11 = scmp.lt.s32.totalorder (!%p136_p10), %s1199_s12, 1  ;;  %s158_s4 = sand.u32 (!%p136_p10), 1, %s1191_s10   ;;  %vm276_vm0 = vcmask (!%p136_p10), 519168  }
   0xf   : > { %139 = sbr.rel (%p136_p10) target bundleno = 313 (0x139), region = 28  ;;  %v713_v2 = vld [vmem:[%s1750_s1 + $0x180] sm:$0xff] (!%p136_p10)  ;;  %v943_v3 = vpack.c.bf16 (!%p136_p10), %v188_v1, %v187_v0  ;;  %v714_v4 = vld [vmem:[%s1750_s1 + $0x188] sm:$0xff] (!%p136_p10)  ;;  %v190_v13 = vld [vmem:[%s1750_s1 + $0x98] sm:$0xff] (!%p136_p10)  ;;  %s694_s5 = sshll.u32 (!%p136_p10), %s158_s4, 4 }
  0x10   : > { %v171_v5 = vld [vmem:[%s1750_s1] sm:$0xff] (!%p136_p10)  ;;  %v172_v6 = vld [vmem:[%s1750_s1 + $0x8] sm:$0xff] (!%p136_p10)  ;;  %v975_v7 = vpack.c.bf16 (!%p136_p10), %v714_v4, %v713_v2  ;;  %v715_v14 = vld [vmem:[%s1750_s1 + $0x190] sm:$0xff] (!%p136_p10)  ;;  %v947_v16 = vpack.c.bf16 (!%p136_p10), %v190_v13, %v189_v11  ;;  %s160_s6 = scalar_lea.vmem (!%p136_p10), [#allocation2], %s694_s5  ;;  %s802_s8 = sshll.u32 (!%p136_p10), %s1199_s12, 8 }
  0x11   : > { %v945_v8 = vpack.c.bf16 (!%p136_p10), %v172_v6, %v171_v5  ;;  %v697_v9 = vld [vmem:[%s1750_s1 + $0x100] sm:$0xff] (!%p136_p10)  ;;  %v698_v10 = vld [vmem:[%s1750_s1 + $0x108] sm:$0xff] (!%p136_p10)  ;;  %944 = vmatprep.subr.bf16.mxu0 (!%p136_p10), %v943_v3  ;;  %v716_v15 = vld [vmem:[%s1750_s1 + $0x198] sm:$0xff] (!%p136_p10)  ;;  %s608_s7 = sshll.u32 (!%p136_p10), %s160_s6, 4  ;;  %s1699_s18 = scalar_lea.hbm (!%p136_p10), %s1751_s2, %s802_s8  ;;  %s1694_s7 = int_to_ptr.vmem [resolvable:$true] %s608_s7 }
  0x12   : > { %v977_v12 = vpack.c.bf16 (!%p136_p10), %v698_v10, %v697_v9  ;;  %976 = vmatprep.subr.bf16.mxu1 (!%p136_p10), %v975_v7  ;;  %v979_v17 = vpack.c.bf16 (!%p136_p10), %v716_v15, %v715_v14  ;;  %v173_v18 = vld [vmem:[%s1750_s1 + $0x10] sm:$0xff] (!%p136_p10)  ;;  %v174_v19 = vld [vmem:[%s1750_s1 + $0x18] sm:$0xff] (!%p136_p10)  ;;  %v191_v23 = vld [vmem:[%s1750_s1 + $0xa0] sm:$0xff] (!%p136_p10)  ;;  %s1129_s24 = scalar_lea.vmem (!%p136_p10), %s1694_s7, 256  ;;  %s1209_s25 = smov (!%p136_p10), [#allocation2]  }
  0x13   : > { %946 = vmatpush3.bf16.msra.mxu0 (!%p136_p10), %v945_v8  ;;  %v699_v20 = vld [vmem:[%s1750_s1 + $0x110] sm:$0xff] (!%p136_p10)  ;;  %v949_v21 = vpack.c.bf16 (!%p136_p10), %v174_v19, %v173_v18  ;;  %v700_v22 = vld [vmem:[%s1750_s1 + $0x118] sm:$0xff] (!%p136_p10)  ;;  %v192_v24 = vld [vmem:[%s1750_s1 + $0xa8] sm:$0xff] (!%p136_p10)  ;;  %p1130_p12 = scmp.ne.s32.totalorder (!%p136_p10), %s1694_s7, %s1129_s24  ;;  %s1133_s26 = sshll.u32 (!%p136_p10), %s1209_s25, 4  ;;  %s1134_s26 = int_to_ptr.vmem [resolvable:$false] %s1133_s26 }
  0x14   : > { %978 = vmatpush3.bf16.msra.mxu1 (!%p136_p10), %v977_v12  ;;  %948 = vmatprep.subr.bf16.mxu0 (!%p136_p10), %v947_v16  ;;  %v981_v25 = vpack.c.bf16 (!%p136_p10), %v700_v22, %v699_v20  ;;  %v951_v26 = vpack.c.bf16 (!%p136_p10), %v192_v24, %v191_v23  ;;  %v717_v27 = vld [vmem:[%s1750_s1 + $0x1a0] sm:$0xff] (!%p136_p10)  ;;  %v718_v28 = vld [vmem:[%s1750_s1 + $0x1a8] sm:$0xff] (!%p136_p10)  ;;  %v193_v35 = vld [vmem:[%s1750_s1 + $0xb0] sm:$0xff] (!%p136_p10)  ;;  %s1135_s27 = scalar_lea.vmem (!%p136_p10), %s1134_s26, 512  ;;  %p1136_p1 = scmp.lt.s32.totalorder (!%p136_p10), %s1694_s7, %s1134_s26 }
  0x15   : > { %980 = vmatprep.subr.bf16.mxu1 (!%p136_p10), %v979_v17  ;;  %v175_v29 = vld [vmem:[%s1750_s1 + $0x20] sm:$0xff] (!%p136_p10)  ;;  %v983_v30 = vpack.c.bf16 (!%p136_p10), %v718_v28, %v717_v27  ;;  %v176_v31 = vld [vmem:[%s1750_s1 + $0x28] sm:$0xff] (!%p136_p10)  ;;  %v194_v36 = vld [vmem:[%s1750_s1 + $0xb8] sm:$0xff] (!%p136_p10)  ;;  %p1131_p13 = pnand (!%p136_p10), %p1130_p12, %p1267_p4  ;;  %p1137_p2 = scmp.lt.s32.totalorder (!%p136_p10), %s1135_s27, %s1129_s24 }
  0x16   : > { %v701_v32 = vld [vmem:[%s1750_s1 + $0x120] sm:$0xff]  ;;  %v702_v33 = vld [vmem:[%s1750_s1 + $0x128] sm:$0xff]  ;;  %v953_v34 = vpack.c.bf16 %v176_v31, %v175_v29  ;;  %v719_v37 = vld [vmem:[%s1750_s1 + $0x1b0] sm:$0xff]  ;;  %v955_v39 = vpack.c.bf16 %v194_v36, %v193_v35  ;;  %s1394_s23 = scalar_select %p161_p11, %s1199_s12, 1 }
  0x17   : > { %950 = vmatpush3.bf16.msra.mxu0 %v949_v21  ;;  %v985_v38 = vpack.c.bf16 %v702_v33, %v701_v32  ;;  %v720_v40 = vld [vmem:[%s1750_s1 + $0x1b8] sm:$0xff]  ;;  %v177_v41 = vld [vmem:[%s1750_s1 + $0x30] sm:$0xff]  ;;  %v195_v46 = vld [vmem:[%s1750_s1 + $0xc0] sm:$0xff]  ;;  %s1703_s12 = scalar_lea.sflag [#allocation3], %s158_s4  ;;  %p1132_p0 = pneg %p1131_p13 }
  0x18   : > { %982 = vmatpush3.bf16.msra.mxu1 %v981_v25  ;;  %952 = vmatprep.subr.bf16.mxu0 %v951_v26  ;;  %v178_v42 = vld [vmem:[%s1750_s1 + $0x38] sm:$0xff]  ;;  %v987_v43 = vpack.c.bf16 %v720_v40, %v719_v37  ;;  %v703_v44 = vld [vmem:[%s1750_s1 + $0x130] sm:$0xff]  ;;  %v196_v47 = vld [vmem:[%s1750_s1 + $0xc8] sm:$0xff]  ;;  %s801_s20 = sshll.u32 %s1394_s23, 3  ;;  %p1138_p3 = por %p1137_p2, %p1136_p1 }
  0x19   : > { %984 = vmatprep.subr.bf16.mxu1 %v983_v30  ;;  %v704_v45 = vld [vmem:[%s1750_s1 + $0x138] sm:$0xff]  ;;  %v721_v48 = vld [vmem:[%s1750_s1 + $0x1c0] sm:$0xff]  ;;  %v722_v49 = vld [vmem:[%s1750_s1 + $0x1c8] sm:$0xff]  ;;  %v957_v50 = vpack.c.bf16 %v178_v42, %v177_v41  ;;  %v959_v52 = vpack.c.bf16 %v196_v47, %v195_v46  ;;  %s169_s15 = scalar_lea.vmem %s1749_s0, %s801_s20 }
  0x1a   : > { %v989_v51 = vpack.c.bf16 %v704_v45, %v703_v44  ;;  %v179_v53 = vld [vmem:[%s1750_s1 + $0x40] sm:$0xff]  ;;  %v180_v54 = vld [vmem:[%s1750_s1 + $0x48] sm:$0xff]  ;;  %v991_v56 = vpack.c.bf16 %v722_v49, %v721_v48  ;;  %v197_v58 = vld [vmem:[%s1750_s1 + $0xd0] sm:$0xff]  ;;  %p1139_p5 = pnand %p1138_p3, %p1132_p0 }
  0x1b   : > { %954 = vmatpush3.bf16.msra.mxu0 %v953_v34  ;;  %v705_v55 = vld [vmem:[%s1750_s1 + $0x140] sm:$0xff]  ;;  %v706_v57 = vld [vmem:[%s1750_s1 + $0x148] sm:$0xff]  ;;  %v198_v59 = vld [vmem:[%s1750_s1 + $0xd8] sm:$0xff]  ;;  %v961_v62 = vpack.c.bf16 %v180_v54, %v179_v53 }
  0x1c   : > { %986 = vmatpush3.bf16.msra.mxu1 %v985_v38  ;;  %956 = vmatprep.subr.bf16.mxu0 %v955_v39  ;;  %v723_v60 = vld [vmem:[%s1750_s1 + $0x1d0] sm:$0xff]  ;;  %v724_v61 = vld [vmem:[%s1750_s1 + $0x1d8] sm:$0xff]  ;;  %v993_v63 = vpack.c.bf16 %v706_v57, %v705_v55  ;;  %v963_v0 = vpack.c.bf16 %v198_v59, %v197_v58  ;;  %v199_v6 = vld [vmem:[%s1750_s1 + $0xe0] sm:$0xff] }
  0x1d   : > { %988 = vmatprep.subr.bf16.mxu1 %v987_v43  ;;  %v181_v1 = vld [vmem:[%s1750_s1 + $0x50] sm:$0xff]  ;;  %v182_v2 = vld [vmem:[%s1750_s1 + $0x58] sm:$0xff]  ;;  %v995_v4 = vpack.c.bf16 %v724_v61, %v723_v60  ;;  %v200_v7 = vld [vmem:[%s1750_s1 + $0xe8] sm:$0xff] }
  0x1e   : > { %v707_v3 = vld [vmem:[%s1750_s1 + $0x150] sm:$0xff]  ;;  %v708_v5 = vld [vmem:[%s1750_s1 + $0x158] sm:$0xff]  ;;  %v725_v8 = vld [vmem:[%s1750_s1 + $0x1e0] sm:$0xff]  ;;  %v965_v10 = vpack.c.bf16 %v182_v2, %v181_v1  ;;  %v967_v13 = vpack.c.bf16 %v200_v7, %v199_v6 }
  0x1f   : > { %958 = vmatpush3.bf16.msra.mxu0 %v957_v50  ;;  %v726_v9 = vld [vmem:[%s1750_s1 + $0x1e8] sm:$0xff]  ;;  %v183_v11 = vld [vmem:[%s1750_s1 + $0x60] sm:$0xff]  ;;  %v997_v12 = vpack.c.bf16 %v708_v5, %v707_v3  ;;  %v201_v19 = vld [vmem:[%s1750_s1 + $0xf0] sm:$0xff] }
  0x20   : > { %990 = vmatpush3.bf16.msra.mxu1 %v989_v51  ;;  %960 = vmatprep.subr.bf16.mxu0 %v959_v52  ;;  %v184_v14 = vld [vmem:[%s1750_s1 + $0x68] sm:$0xff]  ;;  %v709_v15 = vld [vmem:[%s1750_s1 + $0x160] sm:$0xff]  ;;  %v999_v17 = vpack.c.bf16 %v726_v9, %v725_v8  ;;  %v202_v20 = vld [vmem:[%s1750_s1 + $0xf8] sm:$0xff] }
  0x21   : > { %992 = vmatprep.subr.bf16.mxu1 %v991_v56  ;;  %v1457_v16 = vld [vmem:[%s169_s15] sm:$0xff]  ;;  %v710_v18 = vld [vmem:[%s1750_s1 + $0x168] sm:$0xff]  ;;  %v727_v22 = vld [vmem:[%s1750_s1 + $0x1f0] sm:$0xff]  ;;  %v969_v24 = vpack.c.bf16 %v184_v14, %v183_v11  ;;  %v971_v26 = vpack.c.bf16 %v202_v20, %v201_v19 }
  0x22   : > { %v1470_v21 = vcombine.high %v1457_v16, %v1457_v16  ;;  %v728_v23 = vld [vmem:[%s1750_s1 + $0x1f8] sm:$0xff]  ;;  %v1001_v25 = vpack.c.bf16 %v710_v18, %v709_v15  ;;  %v185_v27 = vld [vmem:[%s1750_s1 + $0x70] sm:$0xff]  ;;  %v746_v32 = vld [vmem:[%s1750_s1 + $0x280] sm:$0xff] }
  0x23   : > { %962 = vmatpush3.bf16.msra.mxu0 %v961_v62  ;;  %v186_v28 = vld [vmem:[%s1750_s1 + $0x78] sm:$0xff]  ;;  %v711_v29 = vld [vmem:[%s1750_s1 + $0x170] sm:$0xff]  ;;  %v1003_v30 = vpack.c.bf16 %v728_v23, %v727_v22  ;;  %v747_v33 = vld [vmem:[%s1750_s1 + $0x288] sm:$0xff] }
  0x24   : > { %994 = vmatpush3.bf16.msra.mxu1 %v993_v63  ;;  %964 = vmatprep.subr.bf16.mxu0 %v963_v0  ;;  %v712_v31 = vld [vmem:[%s1750_s1 + $0x178] sm:$0xff]  ;;  %v779_v34 = vld [vmem:[%s1750_s1 + $0x380] sm:$0xff]  ;;  %v780_v35 = vld [vmem:[%s1750_s1 + $0x388] sm:$0xff]  ;;  %v973_v36 = vpack.c.bf16 %v186_v28, %v185_v27  ;;  %v1007_v38 = vpack.c.bf16 %v747_v33, %v746_v32 }
  0x25   : > { %996 = vmatprep.subr.bf16.mxu1 %v995_v4  ;;  %270 = vmatprep.mubr.f32.mxu0 %v1470_v21  ;;  %v1005_v37 = vpack.c.bf16 %v712_v31, %v711_v29  ;;  %v730_v39 = vld [vmem:[%s1750_s1 + $0x200] sm:$0xff]  ;;  %v731_v40 = vld [vmem:[%s1750_s1 + $0x208] sm:$0xff]  ;;  %v1039_v42 = vpack.c.bf16 %v780_v35, %v779_v34  ;;  %v748_v44 = vld [vmem:[%s1750_s1 + $0x290] sm:$0xff] }
  0x26   : > { %375 = vmatprep.mubr.f32.mxu1 %v1470_v21  ;;  %v763_v41 = vld [vmem:[%s1750_s1 + $0x300] sm:$0xff]  ;;  %v764_v43 = vld [vmem:[%s1750_s1 + $0x308] sm:$0xff]  ;;  %v749_v45 = vld [vmem:[%s1750_s1 + $0x298] sm:$0xff]  ;;  %v1009_v48 = vpack.c.bf16 %v731_v40, %v730_v39 }
  0x27   : > { %966 = vmatpush3.bf16.msra.mxu0 %v965_v10  ;;  %v781_v46 = vld [vmem:[%s1750_s1 + $0x390] sm:$0xff]  ;;  %v782_v47 = vld [vmem:[%s1750_s1 + $0x398] sm:$0xff]  ;;  %v1041_v49 = vpack.c.bf16 %v764_v43, %v763_v41  ;;  %v1011_v50 = vpack.c.bf16 %v749_v45, %v748_v44  ;;  %v750_v56 = vld [vmem:[%s1750_s1 + $0x2a0] sm:$0xff] }
  0x28   : > { %998 = vmatpush3.bf16.msra.mxu1 %v997_v12  ;;  %968 = vmatprep.subr.bf16.mxu0 %v967_v13  ;;  %v732_v51 = vld [vmem:[%s1750_s1 + $0x210] sm:$0xff]  ;;  %v733_v52 = vld [vmem:[%s1750_s1 + $0x218] sm:$0xff]  ;;  %v1043_v54 = vpack.c.bf16 %v782_v47, %v781_v46  ;;  %v751_v57 = vld [vmem:[%s1750_s1 + $0x2a8] sm:$0xff] }
  0x29   : > { %1000 = vmatprep.subr.bf16.mxu1 %v999_v17  ;;  %v765_v53 = vld [vmem:[%s1750_s1 + $0x310] sm:$0xff]  ;;  %v766_v55 = vld [vmem:[%s1750_s1 + $0x318] sm:$0xff]  ;;  %v783_v58 = vld [vmem:[%s1750_s1 + $0x3a0] sm:$0xff]  ;;  %v1013_v60 = vpack.c.bf16 %v733_v52, %v732_v51  ;;  %v1015_v62 = vpack.c.bf16 %v751_v57, %v750_v56 }
  0x2a   : > { %v784_v59 = vld [vmem:[%s1750_s1 + $0x3a8] sm:$0xff]  ;;  %v1045_v61 = vpack.c.bf16 %v766_v55, %v765_v53  ;;  %v734_v63 = vld [vmem:[%s1750_s1 + $0x220] sm:$0xff]  ;;  %v752_v4 = vld [vmem:[%s1750_s1 + $0x2b0] sm:$0xff] }
  0x2b   : > { %970 = vmatpush3.bf16.msra.mxu0 %v969_v24  ;;  %v735_v0 = vld [vmem:[%s1750_s1 + $0x228] sm:$0xff]  ;;  %v767_v1 = vld [vmem:[%s1750_s1 + $0x320] sm:$0xff]  ;;  %v1047_v2 = vpack.c.bf16 %v784_v59, %v783_v58  ;;  %v753_v5 = vld [vmem:[%s1750_s1 + $0x2b8] sm:$0xff] }
  0x2c   : > { %1002 = vmatpush3.bf16.msra.mxu1 %v1001_v25  ;;  %972 = vmatprep.subr.bf16.mxu0 %v971_v26  ;;  %v768_v3 = vld [vmem:[%s1750_s1 + $0x328] sm:$0xff]  ;;  %v785_v6 = vld [vmem:[%s1750_s1 + $0x3b0] sm:$0xff]  ;;  %v786_v7 = vld [vmem:[%s1750_s1 + $0x3b8] sm:$0xff]  ;;  %v1017_v8 = vpack.c.bf16 %v735_v0, %v734_v63  ;;  %v1019_v10 = vpack.c.bf16 %v753_v5, %v752_v4 }
  0x2d   : > { %1004 = vmatprep.subr.bf16.mxu1 %v1003_v30  ;;  %v1049_v9 = vpack.c.bf16 %v768_v3, %v767_v1  ;;  %v736_v11 = vld [vmem:[%s1750_s1 + $0x230] sm:$0xff]  ;;  %v737_v12 = vld [vmem:[%s1750_s1 + $0x238] sm:$0xff]  ;;  %v1051_v14 = vpack.c.bf16 %v786_v7, %v785_v6  ;;  %v754_v17 = vld [vmem:[%s1750_s1 + $0x2c0] sm:$0xff] }
  0x2e   : > { %v769_v13 = vld [vmem:[%s1750_s1 + $0x330] sm:$0xff]  ;;  %v770_v15 = vld [vmem:[%s1750_s1 + $0x338] sm:$0xff]  ;;  %v755_v18 = vld [vmem:[%s1750_s1 + $0x2c8] sm:$0xff] }
  0x2f   : > { %974 = vmatpush3.bf16.msra.mxu0 %v973_v36  ;;  %v787_v19 = vld [vmem:[%s1750_s1 + $0x3c0] sm:$0xff]  ;;  %v788_v20 = vld [vmem:[%s1750_s1 + $0x3c8] sm:$0xff]  ;;  %v1053_v22 = vpack.c.bf16 %v770_v15, %v769_v13  ;;  %v1023_v23 = vpack.c.bf16 %v755_v18, %v754_v17  ;;  %v756_v29 = vld [vmem:[%s1750_s1 + $0x2d0] sm:$0xff] }
  0x30   : > { %1006 = vmatpush3.bf16.msra.mxu1 %v1005_v37  ;;  %1008 = vmatprep.subr.bf16.mxu0 %v1007_v38  ;;  %v738_v24 = vld [vmem:[%s1750_s1 + $0x240] sm:$0xff]  ;;  %v739_v25 = vld [vmem:[%s1750_s1 + $0x248] sm:$0xff]  ;;  %v1055_v27 = vpack.c.bf16 %v788_v20, %v787_v19  ;;  %v757_v30 = vld [vmem:[%s1750_s1 + $0x2d8] sm:$0xff] }
  0x31   : > { %1040 = vmatprep.subr.bf16.mxu1 %v1039_v42  ;;  %v771_v26 = vld [vmem:[%s1750_s1 + $0x340] sm:$0xff]  ;;  %v772_v28 = vld [vmem:[%s1750_s1 + $0x348] sm:$0xff]  ;;  %v789_v31 = vld [vmem:[%s1750_s1 + $0x3d0] sm:$0xff]  ;;  %v1025_v33 = vpack.c.bf16 %v739_v25, %v738_v24  ;;  %v1027_v35 = vpack.c.bf16 %v757_v30, %v756_v29 }
  0x32   : > { %271 = vmatmul.mubr.f32.vlgmr.msra.gmra.mrb[0].mxu0 %v1457_v16  ;;  %v790_v32 = vld [vmem:[%s1750_s1 + $0x3d8] sm:$0xff]  ;;  %v1057_v34 = vpack.c.bf16 %v772_v28, %v771_v26  ;;  %v740_v36 = vld [vmem:[%s1750_s1 + $0x250] sm:$0xff]  ;;  %v758_v41 = vld [vmem:[%s1750_s1 + $0x2e0] sm:$0xff] }
  0x33   : > { %376 = vmatmul.mubr.f32.vlgmr.msra.gmra.mrb[0].mxu1 %v1457_v16  ;;  %1010 = vmatpush3.bf16.msra.mxu0 %v1009_v48  ;;  %v741_v37 = vld [vmem:[%s1750_s1 + $0x258] sm:$0xff]  ;;  %v773_v38 = vld [vmem:[%s1750_s1 + $0x350] sm:$0xff]  ;;  %v1059_v39 = vpack.c.bf16 %v790_v32, %v789_v31  ;;  %v759_v42 = vld [vmem:[%s1750_s1 + $0x2e8] sm:$0xff] }
  0x34   : > { %1042 = vmatpush3.bf16.msra.mxu1 %v1041_v49  ;;  %1012 = vmatprep.subr.bf16.mxu0 %v1011_v50  ;;  %v774_v40 = vld [vmem:[%s1750_s1 + $0x358] sm:$0xff]  ;;  %v791_v43 = vld [vmem:[%s1750_s1 + $0x3e0] sm:$0xff]  ;;  %v792_v44 = vld [vmem:[%s1750_s1 + $0x3e8] sm:$0xff]  ;;  %v1029_v45 = vpack.c.bf16 %v741_v37, %v740_v36  ;;  %v1031_v47 = vpack.c.bf16 %v759_v42, %v758_v41 }
  0x35   : > { %1044 = vmatprep.subr.bf16.mxu1 %v1043_v54  ;;  %480 = vmatprep.mubr.f32.mxu0 %v1470_v21  ;;  %v1061_v46 = vpack.c.bf16 %v774_v40, %v773_v38  ;;  %v742_v48 = vld [vmem:[%s1750_s1 + $0x260] sm:$0xff]  ;;  %v743_v49 = vld [vmem:[%s1750_s1 + $0x268] sm:$0xff]  ;;  %v1063_v51 = vpack.c.bf16 %v792_v44, %v791_v43  ;;  %v760_v53 = vld [vmem:[%s1750_s1 + $0x2f0] sm:$0xff] }
  0x36   : > { %585 = vmatprep.mubr.f32.mxu1 %v1470_v21  ;;  %v1021_v21 = vpack.c.bf16 %v737_v12, %v736_v11  ;;  %v775_v50 = vld [vmem:[%s1750_s1 + $0x360] sm:$0xff]  ;;  %v776_v52 = vld [vmem:[%s1750_s1 + $0x368] sm:$0xff]  ;;  %v761_v54 = vld [vmem:[%s1750_s1 + $0x2f8] sm:$0xff]  ;;  %v1033_v57 = vpack.c.bf16 %v743_v49, %v742_v48 }
  0x37   : > { %1014 = vmatpush3.bf16.msra.mxu0 %v1013_v60  ;;  %v793_v55 = vld [vmem:[%s1750_s1 + $0x3f0] sm:$0xff]  ;;  %v794_v56 = vld [vmem:[%s1750_s1 + $0x3f8] sm:$0xff]  ;;  %v1065_v58 = vpack.c.bf16 %v776_v52, %v775_v50  ;;  %v1035_v59 = vpack.c.bf16 %v761_v54, %v760_v53 }
  0x38   : > { %1046 = vmatpush3.bf16.msra.mxu1 %v1045_v61  ;;  %1016 = vmatprep.subr.bf16.mxu0 %v1015_v62  ;;  %v744_v60 = vld [vmem:[%s1750_s1 + $0x270] sm:$0xff]  ;;  %v745_v61 = vld [vmem:[%s1750_s1 + $0x278] sm:$0xff]  ;;  %v1067_v62 = vpack.c.bf16 %v794_v56, %v793_v55 }
  0x39   : > { %1048 = vmatprep.subr.bf16.mxu1 %v1047_v2  ;;  %v777_v63 = vld [vmem:[%s1750_s1 + $0x370] sm:$0xff]  ;;  %v778_v0 = vld [vmem:[%s1750_s1 + $0x378] sm:$0xff]  ;;  %v1037_v1 = vpack.c.bf16 %v745_v61, %v744_v60 }
  0x3a   : > { %v1069_v2 = vpack.c.bf16 %v778_v0, %v777_v63 }
  0x3b   : > { %1018 = vmatpush3.bf16.msra.mxu0 %v1017_v8 }
  0x3c   : > { %1050 = vmatpush3.bf16.msra.mxu1 %v1049_v9  ;;  %1020 = vmatprep.subr.bf16.mxu0 %v1019_v10 }
  0x3d   : > { %1052 = vmatprep.subr.bf16.mxu1 %v1051_v14 }
  0x3f   : > { %1022 = vmatpush3.bf16.msra.mxu0 %v1021_v21 }
  0x40   : > { %1054 = vmatpush3.bf16.msra.mxu1 %v1053_v22  ;;  %1024 = vmatprep.subr.bf16.mxu0 %v1023_v23 }
  0x41   : > { %1056 = vmatprep.subr.bf16.mxu1 %v1055_v27 }
  0x43   : > { %1026 = vmatpush3.bf16.msra.mxu0 %v1025_v33 }
  0x44   : > { %1058 = vmatpush3.bf16.msra.mxu1 %v1057_v34  ;;  %1028 = vmatprep.subr.bf16.mxu0 %v1027_v35 }
  0x45   : > { %1060 = vmatprep.subr.bf16.mxu1 %v1059_v39 }
  0x47   : > { %1030 = vmatpush3.bf16.msra.mxu0 %v1029_v45 }
  0x48   : > { %1062 = vmatpush3.bf16.msra.mxu1 %v1061_v46  ;;  %1032 = vmatprep.subr.bf16.mxu0 %v1031_v47 }
  0x49   : > { %1064 = vmatprep.subr.bf16.mxu1 %v1063_v51 }
  0x4b   : > { %1034 = vmatpush3.bf16.msra.mxu0 %v1033_v57 }
  0x4c   : > { %1066 = vmatpush3.bf16.msra.mxu1 %v1065_v58  ;;  %1036 = vmatprep.subr.bf16.mxu0 %v1035_v59 }
  0x4d   : > { %1068 = vmatprep.subr.bf16.mxu1 %v1067_v62 }
  0x4f   : > { %1038 = vmatpush3.bf16.msra.mxu0 %v1037_v1 }
  0x50   : > { %1070 = vmatpush3.bf16.msra.mxu1 %v1069_v2 }
  0x52   : > { %481 = vmatmul.mubr.f32.vlgmr.msra.gmra.mrb[2].mxu0 %v1457_v16 }
  0x53   : > { %586 = vmatmul.mubr.f32.vlgmr.msra.gmra.mrb[2].mxu1 %v1457_v16 }
 0x105   : > { %v835_v3 = vpop.f32.mrb[0].mxu0 }
 0x106   : > { %v870_v4 = vpop.f32.mrb[0].mxu1  ;;  %v836_v5 = vpop.f32.mrb[1].mxu0 }
 0x107   : > { %v837_v6 = vadd.f32 %v836_v5, %v835_v3  ;;  %v871_v7 = vpop.f32.mrb[1].mxu1 }
 0x108   : > { %v872_v8 = vadd.f32 %v871_v7, %v870_v4 }
 0x109   : > { %277 = vst.msk [vmem:[%s160_s6] sm:$0xf] %vm276_vm0, %v837_v6 }
 0x10a   : > { %729 = vst.msk [vmem:[%s160_s6 + $0x4] sm:$0xf] %vm276_vm0, %v872_v8 }
 0x125   : > { %v905_v9 = vpop.f32.mrb[2].mxu0 }
 0x126   : > { %v940_v10 = vpop.f32.mrb[2].mxu1  ;;  %v906_v16 = vpop.f32.mrb[3].mxu0 }
 0x127   : > { %v907_v11 = vadd.f32 %v906_v16, %v905_v9  ;;  %v941_v12 = vpop.f32.mrb[3].mxu1 }
 0x128   : > { %v942_v13 = vadd.f32 %v941_v12, %v940_v10 }
 0x129   : > { %762 = vst.msk [vmem:[%s160_s6 + $0x8] sm:$0xf] %vm276_vm0, %v907_v11 }
 0x12a   : > { %795 = vst.msk [vmem:[%s160_s6 + $0xc] sm:$0xf] %vm276_vm0, %v942_v13 }
 0x12b   : > { %1142 = shalt.err (!%p1139_p5)
}
 0x12c   : > { %s1143_s28 = scalar_lea.hbm %s1699_s18, 256  ;;  %s1147_s23 = scalar_lea.hbm %s1751_s2, 512 }
 0x12d   : > { %p1144_p6 = scmp.ne.s32.totalorder %s1699_s18, %s1143_s28  ;;  %p1148_p10 = scmp.lt.u32.totalorder %s1699_s18, %s1751_s2 }
 0x12e   : > { %p1149_p11 = scmp.lt.u32.totalorder %s1147_s23, %s1143_s28  ;;  %p1151_p13 = scmp.lt.u32.totalorder %s1143_s28, %s1699_s18 }
 0x12f   : > { %p1145_p7 = pnand %p1144_p6, %p1267_p4 }
 0x130   : > { %p1150_p12 = por %p1149_p11, %p1148_p10 }
 0x131   : > { %p1146_p9 = pneg %p1145_p7 }
 0x132   : > { %p1152_p0 = por %p1151_p13, %p1150_p12 }
 0x134   : > { %p1153_p1 = pnand %p1152_p0, %p1146_p9 }
 0x136   : > { %1156 = shalt.err (!%p1153_p1)
}
 0x137   : > { %s1210_s4 = smov 64   ;;  %s1211_s5 = smov 4  }
 0x138   : > { %1071 = dma.vmem_to_hbm [thread:$0]  (%p1267_p4), %s1694_s7, 256, %s1699_s18, %s1703_s12, %s1210_s4, %s1210_s4, %s1211_s5  }
 0x139 PF: > { %p1077_p2 = scmp.ge.s32.totalorder %s1207_s14, 2  ;;  %s623_s6 = sand.u32 1, %s1187_s9  }
 0x13a   : > { %s624_s8 = scalar_lea.sflag [#allocation3], %s623_s6 }
 0x13b   : > { %p1074_p3 = pnand %p1077_p2, %p1274_p8 }
 0x13d   : > { %1182 = dma.done.wait (!%p1074_p3), %s624_s8, 256  }
 0x13e   : > { %1184 = vsyncadd (!%p1074_p3), %s624_s8, 4294967040  ;;  %s15_s14 = sadd.s32 1, %s1207_s14   ;;  %s1754_s9 = smov %s1191_s10 }
 0x13f   : > { %p12_p5 = scmp.ge.s32.totalorder %s15_s14, 4   ;;  %s1755_s10 = smov %s1195_s11 }
 0x140   : > { %s1756_s11 = smov %s1280_s22  ;;  %s1757_s12 = smov %s1203_s13 }
 0x141   : > { %s1758_s13 = smov %s1760_s17  ;;  %14 = sbr.rel (!%p12_p5) target bundleno = 4 (0x4), region = 69 }
 0x148   :  { %629 = vsyncpa [#allocation3], 1 }
 0x149   :  { %631 = vsyncpa [#allocation3 + $0x1], 1 }

</bundles_post_ra>
